<compile_context>
chip_gen: v5e
topology: v5e:2x2
jax: 0.10.0
libtpu: 0.0.40
codegen_flags: <defaults>
</compile_context>

<pallas_src>
import functools

import jax
import jax.numpy as jnp
from jax import lax
from jax.experimental import pallas as pl
from jax.experimental.pallas import tpu as pltpu


def _lstm_cls_kernel(x_ref, wih_ref, whh_ref, b_ref, wfc_ref, bfc_ref,
                     out_ref, xw_ref, *, B, T, H):
    """Whole LSTM + classifier head in one invocation.

    x_ref   : (T*B, F)   bf16  time-major flattened input
    wih_ref : (F, 4H)    bf16  input weights, gate order [i, f, g, o]
    whh_ref : (H, 4H)    bf16  recurrent weights
    b_ref   : (1, 4H)    f32   combined bias (b_ih + b_hh)
    wfc_ref : (H, C)     f32   classifier weights
    bfc_ref : (1, C)     f32   classifier bias
    out_ref : (B, C)     f32   sigmoid(logits), written once
    xw_ref  : (T*B, 4H)  f32   VMEM scratch, hoisted input projection
    """
    # ---- Phase 1: hoist x @ W_ih + b out of the recurrence -----------------
    # One big MXU-friendly matmul off the serial path instead of T tiny ones.
    xw_ref[...] = (
        jnp.dot(x_ref[...], wih_ref[...], preferred_element_type=jnp.float32)
        + b_ref[...])

    # ---- Phase 2: the serial recurrence ------------------------------------
    # h/c stay in the fori_loop carry (vregs).  gates is a single 128-lane
    # vreg; gate extraction is static lane slices (XLU) and the nonlinearity
    # cost is ~1.5 full-vreg EUP passes per step.
    def step(t, carry):
        h, c = carry                                        # (B, H) f32 each
        row = pl.multiple_of(t * B, B)
        xw_t = xw_ref[pl.ds(row, B), :]                     # (B, 4H) f32
        gates = xw_t + jnp.dot(h.astype(jnp.bfloat16), whh_ref[...],
                               preferred_element_type=jnp.float32)
        sig = jax.nn.sigmoid(gates)      # one EUP pass covers i, f, o blocks
        i_g = sig[:, 0 * H:1 * H]
        f_g = sig[:, 1 * H:2 * H]
        o_g = sig[:, 3 * H:4 * H]
        g_g = jnp.tanh(gates[:, 2 * H:3 * H])
        c = f_g * c + i_g * g_g
        h = o_g * jnp.tanh(c)
        return h, c

    h0 = jnp.zeros((B, H), jnp.float32)
    c0 = jnp.zeros((B, H), jnp.float32)
    h, _ = lax.fori_loop(0, T, step, (h0, c0), unroll=min(T, 8))

    # ---- Phase 3: classifier head on the last hidden state (runs once) -----
    logits = (jnp.dot(h, wfc_ref[...], preferred_element_type=jnp.float32)
              + bfc_ref[...])
    out_ref[...] = jax.nn.sigmoid(logits)


def prepare_params(params):
    """One-time weight prep (kept OUT of the per-call path).

    Matmul weight operands go to bf16 (MXU-native on v5e/v6e/v7x); biases and
    the tiny classifier head stay f32.  Accumulation is always f32 in-kernel.
    """
    return {
        "w_ih_t": params["w_ih_t"].astype(jnp.bfloat16),   # (F, 4H)
        "w_hh_t": params["w_hh_t"].astype(jnp.bfloat16),   # (H, 4H)
        "b":      params["b"].astype(jnp.float32),         # (1, 4H)
        "w_fc_t": params["w_fc_t"].astype(jnp.float32),    # (H, C)
        "b_fc":   params["b_fc"].astype(jnp.float32),      # (1, C)
    }


@jax.jit
def simple_rnn_classification(data, prep):
    """data: (B, T, F) float32.  Returns sigmoid(Linear(h_T)) of shape (B, C)."""
    B, T, F = data.shape
    H = prep["w_hh_t"].shape[0]
    C = prep["w_fc_t"].shape[1]

    # Time-major, flattened activations: row t*B + b is data[b, t, :].
    # (Per-call work is just this transpose+cast; weights are pre-prepared.)
    x2d = jnp.transpose(data, (1, 0, 2)).reshape(T * B, F).astype(jnp.bfloat16)

    # Size-aware VMEM budget (whole-array residents + scratch, with headroom
    # for double-buffering), clamped below v7x's scoped ceiling.
    resident_bytes = (x2d.size * 2
                      + prep["w_ih_t"].size * 2 + prep["w_hh_t"].size * 2
                      + prep["b"].size * 4 + prep["w_fc_t"].size * 4
                      + prep["b_fc"].size * 4
                      + B * C * 4                # output
                      + T * B * 4 * H * 4)       # xw scratch
    vmem_limit = int(min(48 * 2**20, max(2 * 2**20, 4 * resident_bytes)))

    kernel = functools.partial(_lstm_cls_kernel, B=B, T=T, H=H)
    vmem = pl.BlockSpec(memory_space=pltpu.MemorySpace.VMEM)

    return pl.pallas_call(
        kernel,
        out_shape=jax.ShapeDtypeStruct((B, C), jnp.float32),
        in_specs=[vmem] * 6,
        out_specs=vmem,
        scratch_shapes=[pltpu.VMEM((T * B, 4 * H), jnp.float32)],
        compiler_params=pltpu.CompilerParams(vmem_limit_bytes=vmem_limit),
    )(x2d, prep["w_ih_t"], prep["w_hh_t"], prep["b"],
      prep["w_fc_t"], prep["b_fc"])


def _reference(data, params):
    """Pure-f32 JAX reference mirroring torch.nn.LSTM(batch_first) + Linear + sigmoid."""
    B, T, F = data.shape
    H = params["w_hh_t"].shape[0]
    h = jnp.zeros((B, H), jnp.float32)
    c = jnp.zeros((B, H), jnp.float32)

    def step(carry, x_t):
        h, c = carry
        gates = x_t @ params["w_ih_t"] + h @ params["w_hh_t"] + params["b"]
        i = jax.nn.sigmoid(gates[:, :H])
        f = jax.nn.sigmoid(gates[:, H:2 * H])
        g = jnp.tanh(gates[:, 2 * H:3 * H])
        o = jax.nn.sigmoid(gates[:, 3 * H:])
        c = f * c + i * g
        h = o * jnp.tanh(c)
        return (h, c), None

    (h, c), _ = jax.lax.scan(step, (h, c), jnp.swapaxes(data, 0, 1))
    return jax.nn.sigmoid(h @ params["w_fc_t"] + params["b_fc"])


if __name__ == "__main__":
    B, T, F, H, C = 8, 8, 16, 32, 4  # batch, seq, feature_num, rnn_hidden_size, class_num

    key = jax.random.PRNGKey(0)
    ks = jax.random.split(key, 7)
    scale = 1.0 / jnp.sqrt(H)
    params = {
        "w_ih_t": jax.random.uniform(ks[0], (F, 4 * H), jnp.float32, -scale, scale),
        "w_hh_t": jax.random.uniform(ks[1], (H, 4 * H), jnp.float32, -scale, scale),
        "b": (jax.random.uniform(ks[2], (1, 4 * H), jnp.float32, -scale, scale)
              + jax.random.uniform(ks[3], (1, 4 * H), jnp.float32, -scale, scale)),
        "w_fc_t": jax.random.uniform(ks[4], (H, C), jnp.float32, -scale, scale),
        "b_fc": jax.random.uniform(ks[5], (1, C), jnp.float32, -scale, scale),
    }
    data = jax.random.normal(ks[6], (B, T, F), jnp.float32)

    prep = prepare_params(params)      # one-time weight prep, off the call path
    out = simple_rnn_classification(data, prep)
    out = jax.block_until_ready(out)

    ref = _reference(data, params)
    assert out.shape == (B, C)
    # bf16 matmul operands (f32 accumulation) vs a pure-f32 reference:
    # tolerance loosened per review; observed error is O(1e-3) on sigmoid
    # outputs in [0, 1].
    assert jnp.max(jnp.abs(out - ref)) < 2e-2, "mismatch vs reference"

    print("KERNEL_OK")
</pallas_src>

<mosaic_0001>
module attributes {stable_mosaic.version = 11 : i64} {
  func.func @_lstm_cls_kernel(%arg0: memref<64x16xbf16, #tpu.memory_space<vmem>>, %arg1: memref<16x128xbf16, #tpu.memory_space<vmem>>, %arg2: memref<32x128xbf16, #tpu.memory_space<vmem>>, %arg3: memref<1x128xf32, #tpu.memory_space<vmem>>, %arg4: memref<32x4xf32, #tpu.memory_space<vmem>>, %arg5: memref<1x4xf32, #tpu.memory_space<vmem>>, %arg6: memref<8x4xf32, #tpu.memory_space<vmem>>, %arg7: memref<64x128xf32, #tpu.memory_space<vmem>>) attributes {dimension_semantics = [], scalar_prefetch = 0 : i64, scratch_operands = 1 : i64, tpu.core_type = #tpu.core_type<tc>} {
    %c0 = arith.constant 0 : index
    %c0_0 = arith.constant 0 : index
    %0 = vector.load %arg0[%c0, %c0_0] : memref<64x16xbf16, #tpu.memory_space<vmem>>, vector<64x16xbf16>
    %c0_1 = arith.constant 0 : index
    %c0_2 = arith.constant 0 : index
    %1 = vector.load %arg1[%c0_1, %c0_2] : memref<16x128xbf16, #tpu.memory_space<vmem>>, vector<16x128xbf16>
    %cst = arith.constant dense<0.000000e+00> : vector<64x128xf32>
    %2 = tpu.matmul %0, %1, %cst {dimension_numbers = #tpu.dot_dimension_numbers<[1], [0], [0], [1], [0, 0, 1, 1], [], []>} : vector<64x16xbf16>, vector<16x128xbf16>, vector<64x128xf32> -> vector<64x128xf32>
    %c0_3 = arith.constant 0 : index
    %c0_4 = arith.constant 0 : index
    %3 = vector.load %arg3[%c0_3, %c0_4] : memref<1x128xf32, #tpu.memory_space<vmem>>, vector<1x128xf32>
    %4 = vector.broadcast %3 : vector<1x128xf32> to vector<64x128xf32>
    %5 = arith.addf %2, %4 : vector<64x128xf32>
    %c0_5 = arith.constant 0 : index
    %c0_6 = arith.constant 0 : index
    %6 = vector.load %arg7[%c0_5, %c0_6] : memref<64x128xf32, #tpu.memory_space<vmem>>, vector<64x128xf32>
    tpu.vector_store %arg7[%c0_5, %c0_6], %5 {strides = array<i32>} : memref<64x128xf32, #tpu.memory_space<vmem>>, vector<64x128xf32>,
    %cst_7 = arith.constant 0.000000e+00 : f32
    %7 = vector.broadcast %cst_7 : f32 to vector<8x32xf32>
    %cst_8 = arith.constant 0.000000e+00 : f32
    %8 = vector.broadcast %cst_8 : f32 to vector<8x32xf32>
    %c0_i32 = arith.constant 0 : i32
    %c8_i32 = arith.constant 8 : i32
    %9 = arith.muli %c0_i32, %c8_i32 : i32
    %10 = tpu.assume_multiple %9, 8 : i32
    %11 = arith.index_cast %10 : i32 to index
    %c0_9 = arith.constant 0 : index
    %12 = vector.load %arg7[%11, %c0_9] : memref<64x128xf32, #tpu.memory_space<vmem>>, vector<8x128xf32>
    %13 = arith.truncf %7 : vector<8x32xf32> to vector<8x32xbf16>
    %c0_10 = arith.constant 0 : index
    %c0_11 = arith.constant 0 : index
    %14 = vector.load %arg2[%c0_10, %c0_11] : memref<32x128xbf16, #tpu.memory_space<vmem>>, vector<32x128xbf16>
    %cst_12 = arith.constant dense<0.000000e+00> : vector<8x128xf32>
    %15 = tpu.matmul %13, %14, %cst_12 {dimension_numbers = #tpu.dot_dimension_numbers<[1], [0], [0], [1], [0, 0, 1, 1], [], []>} : vector<8x32xbf16>, vector<32x128xbf16>, vector<8x128xf32> -> vector<8x128xf32>
    %16 = arith.addf %12, %15 : vector<8x128xf32>
    %17 = arith.negf %16 : vector<8x128xf32>
    %18 = math.exp %17 : vector<8x128xf32>
    %cst_13 = arith.constant 1.000000e+00 : f32
    %19 = vector.broadcast %cst_13 : f32 to vector<8x128xf32>
    %20 = arith.addf %19, %18 : vector<8x128xf32>
    %21 = arith.divf %19, %20 : vector<8x128xf32>
    %22 = vector.extract_strided_slice %21 {offsets = [0, 0], sizes = [8, 32], strides = [1, 1]} : vector<8x128xf32> to vector<8x32xf32>
    %23 = vector.extract_strided_slice %21 {offsets = [0, 32], sizes = [8, 32], strides = [1, 1]} : vector<8x128xf32> to vector<8x32xf32>
    %24 = vector.extract_strided_slice %21 {offsets = [0, 96], sizes = [8, 32], strides = [1, 1]} : vector<8x128xf32> to vector<8x32xf32>
    %25 = vector.extract_strided_slice %16 {offsets = [0, 64], sizes = [8, 32], strides = [1, 1]} : vector<8x128xf32> to vector<8x32xf32>
    %26 = math.tanh %25 : vector<8x32xf32>
    %27 = arith.mulf %23, %8 : vector<8x32xf32>
    %28 = arith.mulf %22, %26 : vector<8x32xf32>
    %29 = arith.addf %27, %28 : vector<8x32xf32>
    %30 = math.tanh %29 : vector<8x32xf32>
    %31 = arith.mulf %24, %30 : vector<8x32xf32>
    %c1_i32 = arith.constant 1 : i32
    %c8_i32_14 = arith.constant 8 : i32
    %32 = arith.muli %c1_i32, %c8_i32_14 : i32
    %33 = tpu.assume_multiple %32, 8 : i32
    %34 = arith.index_cast %33 : i32 to index
    %c0_15 = arith.constant 0 : index
    %35 = vector.load %arg7[%34, %c0_15] : memref<64x128xf32, #tpu.memory_space<vmem>>, vector<8x128xf32>
    %36 = arith.truncf %31 : vector<8x32xf32> to vector<8x32xbf16>
    %c0_16 = arith.constant 0 : index
    %c0_17 = arith.constant 0 : index
    %37 = vector.load %arg2[%c0_16, %c0_17] : memref<32x128xbf16, #tpu.memory_space<vmem>>, vector<32x128xbf16>
    %cst_18 = arith.constant dense<0.000000e+00> : vector<8x128xf32>
    %38 = tpu.matmul %36, %37, %cst_18 {dimension_numbers = #tpu.dot_dimension_numbers<[1], [0], [0], [1], [0, 0, 1, 1], [], []>} : vector<8x32xbf16>, vector<32x128xbf16>, vector<8x128xf32> -> vector<8x128xf32>
    %39 = arith.addf %35, %38 : vector<8x128xf32>
    %40 = arith.negf %39 : vector<8x128xf32>
    %41 = math.exp %40 : vector<8x128xf32>
    %cst_19 = arith.constant 1.000000e+00 : f32
    %42 = vector.broadcast %cst_19 : f32 to vector<8x128xf32>
    %43 = arith.addf %42, %41 : vector<8x128xf32>
    %44 = arith.divf %42, %43 : vector<8x128xf32>
    %45 = vector.extract_strided_slice %44 {offsets = [0, 0], sizes = [8, 32], strides = [1, 1]} : vector<8x128xf32> to vector<8x32xf32>
    %46 = vector.extract_strided_slice %44 {offsets = [0, 32], sizes = [8, 32], strides = [1, 1]} : vector<8x128xf32> to vector<8x32xf32>
    %47 = vector.extract_strided_slice %44 {offsets = [0, 96], sizes = [8, 32], strides = [1, 1]} : vector<8x128xf32> to vector<8x32xf32>
    %48 = vector.extract_strided_slice %39 {offsets = [0, 64], sizes = [8, 32], strides = [1, 1]} : vector<8x128xf32> to vector<8x32xf32>
    %49 = math.tanh %48 : vector<8x32xf32>
    %50 = arith.mulf %46, %29 : vector<8x32xf32>
    %51 = arith.mulf %45, %49 : vector<8x32xf32>
    %52 = arith.addf %50, %51 : vector<8x32xf32>
    %53 = math.tanh %52 : vector<8x32xf32>
    %54 = arith.mulf %47, %53 : vector<8x32xf32>
    %c2_i32 = arith.constant 2 : i32
    %c8_i32_20 = arith.constant 8 : i32
    %55 = arith.muli %c2_i32, %c8_i32_20 : i32
    %56 = tpu.assume_multiple %55, 8 : i32
    %57 = arith.index_cast %56 : i32 to index
    %c0_21 = arith.constant 0 : index
    %58 = vector.load %arg7[%57, %c0_21] : memref<64x128xf32, #tpu.memory_space<vmem>>, vector<8x128xf32>
    %59 = arith.truncf %54 : vector<8x32xf32> to vector<8x32xbf16>
    %c0_22 = arith.constant 0 : index
    %c0_23 = arith.constant 0 : index
    %60 = vector.load %arg2[%c0_22, %c0_23] : memref<32x128xbf16, #tpu.memory_space<vmem>>, vector<32x128xbf16>
    %cst_24 = arith.constant dense<0.000000e+00> : vector<8x128xf32>
    %61 = tpu.matmul %59, %60, %cst_24 {dimension_numbers = #tpu.dot_dimension_numbers<[1], [0], [0], [1], [0, 0, 1, 1], [], []>} : vector<8x32xbf16>, vector<32x128xbf16>, vector<8x128xf32> -> vector<8x128xf32>
    %62 = arith.addf %58, %61 : vector<8x128xf32>
    %63 = arith.negf %62 : vector<8x128xf32>
    %64 = math.exp %63 : vector<8x128xf32>
    %cst_25 = arith.constant 1.000000e+00 : f32
    %65 = vector.broadcast %cst_25 : f32 to vector<8x128xf32>
    %66 = arith.addf %65, %64 : vector<8x128xf32>
    %67 = arith.divf %65, %66 : vector<8x128xf32>
    %68 = vector.extract_strided_slice %67 {offsets = [0, 0], sizes = [8, 32], strides = [1, 1]} : vector<8x128xf32> to vector<8x32xf32>
    %69 = vector.extract_strided_slice %67 {offsets = [0, 32], sizes = [8, 32], strides = [1, 1]} : vector<8x128xf32> to vector<8x32xf32>
    %70 = vector.extract_strided_slice %67 {offsets = [0, 96], sizes = [8, 32], strides = [1, 1]} : vector<8x128xf32> to vector<8x32xf32>
    %71 = vector.extract_strided_slice %62 {offsets = [0, 64], sizes = [8, 32], strides = [1, 1]} : vector<8x128xf32> to vector<8x32xf32>
    %72 = math.tanh %71 : vector<8x32xf32>
    %73 = arith.mulf %69, %52 : vector<8x32xf32>
    %74 = arith.mulf %68, %72 : vector<8x32xf32>
    %75 = arith.addf %73, %74 : vector<8x32xf32>
    %76 = math.tanh %75 : vector<8x32xf32>
    %77 = arith.mulf %70, %76 : vector<8x32xf32>
    %c3_i32 = arith.constant 3 : i32
    %c8_i32_26 = arith.constant 8 : i32
    %78 = arith.muli %c3_i32, %c8_i32_26 : i32
    %79 = tpu.assume_multiple %78, 8 : i32
    %80 = arith.index_cast %79 : i32 to index
    %c0_27 = arith.constant 0 : index
    %81 = vector.load %arg7[%80, %c0_27] : memref<64x128xf32, #tpu.memory_space<vmem>>, vector<8x128xf32>
    %82 = arith.truncf %77 : vector<8x32xf32> to vector<8x32xbf16>
    %c0_28 = arith.constant 0 : index
    %c0_29 = arith.constant 0 : index
    %83 = vector.load %arg2[%c0_28, %c0_29] : memref<32x128xbf16, #tpu.memory_space<vmem>>, vector<32x128xbf16>
    %cst_30 = arith.constant dense<0.000000e+00> : vector<8x128xf32>
    %84 = tpu.matmul %82, %83, %cst_30 {dimension_numbers = #tpu.dot_dimension_numbers<[1], [0], [0], [1], [0, 0, 1, 1], [], []>} : vector<8x32xbf16>, vector<32x128xbf16>, vector<8x128xf32> -> vector<8x128xf32>
    %85 = arith.addf %81, %84 : vector<8x128xf32>
    %86 = arith.negf %85 : vector<8x128xf32>
    %87 = math.exp %86 : vector<8x128xf32>
    %cst_31 = arith.constant 1.000000e+00 : f32
    %88 = vector.broadcast %cst_31 : f32 to vector<8x128xf32>
    %89 = arith.addf %88, %87 : vector<8x128xf32>
    %90 = arith.divf %88, %89 : vector<8x128xf32>
    %91 = vector.extract_strided_slice %90 {offsets = [0, 0], sizes = [8, 32], strides = [1, 1]} : vector<8x128xf32> to vector<8x32xf32>
    %92 = vector.extract_strided_slice %90 {offsets = [0, 32], sizes = [8, 32], strides = [1, 1]} : vector<8x128xf32> to vector<8x32xf32>
    %93 = vector.extract_strided_slice %90 {offsets = [0, 96], sizes = [8, 32], strides = [1, 1]} : vector<8x128xf32> to vector<8x32xf32>
    %94 = vector.extract_strided_slice %85 {offsets = [0, 64], sizes = [8, 32], strides = [1, 1]} : vector<8x128xf32> to vector<8x32xf32>
    %95 = math.tanh %94 : vector<8x32xf32>
    %96 = arith.mulf %92, %75 : vector<8x32xf32>
    %97 = arith.mulf %91, %95 : vector<8x32xf32>
    %98 = arith.addf %96, %97 : vector<8x32xf32>
    %99 = math.tanh %98 : vector<8x32xf32>
    %100 = arith.mulf %93, %99 : vector<8x32xf32>
    %c4_i32 = arith.constant 4 : i32
    %c8_i32_32 = arith.constant 8 : i32
    %101 = arith.muli %c4_i32, %c8_i32_32 : i32
    %102 = tpu.assume_multiple %101, 8 : i32
    %103 = arith.index_cast %102 : i32 to index
    %c0_33 = arith.constant 0 : index
    %104 = vector.load %arg7[%103, %c0_33] : memref<64x128xf32, #tpu.memory_space<vmem>>, vector<8x128xf32>
    %105 = arith.truncf %100 : vector<8x32xf32> to vector<8x32xbf16>
    %c0_34 = arith.constant 0 : index
    %c0_35 = arith.constant 0 : index
    %106 = vector.load %arg2[%c0_34, %c0_35] : memref<32x128xbf16, #tpu.memory_space<vmem>>, vector<32x128xbf16>
    %cst_36 = arith.constant dense<0.000000e+00> : vector<8x128xf32>
    %107 = tpu.matmul %105, %106, %cst_36 {dimension_numbers = #tpu.dot_dimension_numbers<[1], [0], [0], [1], [0, 0, 1, 1], [], []>} : vector<8x32xbf16>, vector<32x128xbf16>, vector<8x128xf32> -> vector<8x128xf32>
    %108 = arith.addf %104, %107 : vector<8x128xf32>
    %109 = arith.negf %108 : vector<8x128xf32>
    %110 = math.exp %109 : vector<8x128xf32>
    %cst_37 = arith.constant 1.000000e+00 : f32
    %111 = vector.broadcast %cst_37 : f32 to vector<8x128xf32>
    %112 = arith.addf %111, %110 : vector<8x128xf32>
    %113 = arith.divf %111, %112 : vector<8x128xf32>
    %114 = vector.extract_strided_slice %113 {offsets = [0, 0], sizes = [8, 32], strides = [1, 1]} : vector<8x128xf32> to vector<8x32xf32>
    %115 = vector.extract_strided_slice %113 {offsets = [0, 32], sizes = [8, 32], strides = [1, 1]} : vector<8x128xf32> to vector<8x32xf32>
    %116 = vector.extract_strided_slice %113 {offsets = [0, 96], sizes = [8, 32], strides = [1, 1]} : vector<8x128xf32> to vector<8x32xf32>
    %117 = vector.extract_strided_slice %108 {offsets = [0, 64], sizes = [8, 32], strides = [1, 1]} : vector<8x128xf32> to vector<8x32xf32>
    %118 = math.tanh %117 : vector<8x32xf32>
    %119 = arith.mulf %115, %98 : vector<8x32xf32>
    %120 = arith.mulf %114, %118 : vector<8x32xf32>
    %121 = arith.addf %119, %120 : vector<8x32xf32>
    %122 = math.tanh %121 : vector<8x32xf32>
    %123 = arith.mulf %116, %122 : vector<8x32xf32>
    %c5_i32 = arith.constant 5 : i32
    %c8_i32_38 = arith.constant 8 : i32
    %124 = arith.muli %c5_i32, %c8_i32_38 : i32
    %125 = tpu.assume_multiple %124, 8 : i32
    %126 = arith.index_cast %125 : i32 to index
    %c0_39 = arith.constant 0 : index
    %127 = vector.load %arg7[%126, %c0_39] : memref<64x128xf32, #tpu.memory_space<vmem>>, vector<8x128xf32>
    %128 = arith.truncf %123 : vector<8x32xf32> to vector<8x32xbf16>
    %c0_40 = arith.constant 0 : index
    %c0_41 = arith.constant 0 : index
    %129 = vector.load %arg2[%c0_40, %c0_41] : memref<32x128xbf16, #tpu.memory_space<vmem>>, vector<32x128xbf16>
    %cst_42 = arith.constant dense<0.000000e+00> : vector<8x128xf32>
    %130 = tpu.matmul %128, %129, %cst_42 {dimension_numbers = #tpu.dot_dimension_numbers<[1], [0], [0], [1], [0, 0, 1, 1], [], []>} : vector<8x32xbf16>, vector<32x128xbf16>, vector<8x128xf32> -> vector<8x128xf32>
    %131 = arith.addf %127, %130 : vector<8x128xf32>
    %132 = arith.negf %131 : vector<8x128xf32>
    %133 = math.exp %132 : vector<8x128xf32>
    %cst_43 = arith.constant 1.000000e+00 : f32
    %134 = vector.broadcast %cst_43 : f32 to vector<8x128xf32>
    %135 = arith.addf %134, %133 : vector<8x128xf32>
    %136 = arith.divf %134, %135 : vector<8x128xf32>
    %137 = vector.extract_strided_slice %136 {offsets = [0, 0], sizes = [8, 32], strides = [1, 1]} : vector<8x128xf32> to vector<8x32xf32>
    %138 = vector.extract_strided_slice %136 {offsets = [0, 32], sizes = [8, 32], strides = [1, 1]} : vector<8x128xf32> to vector<8x32xf32>
    %139 = vector.extract_strided_slice %136 {offsets = [0, 96], sizes = [8, 32], strides = [1, 1]} : vector<8x128xf32> to vector<8x32xf32>
    %140 = vector.extract_strided_slice %131 {offsets = [0, 64], sizes = [8, 32], strides = [1, 1]} : vector<8x128xf32> to vector<8x32xf32>
    %141 = math.tanh %140 : vector<8x32xf32>
    %142 = arith.mulf %138, %121 : vector<8x32xf32>
    %143 = arith.mulf %137, %141 : vector<8x32xf32>
    %144 = arith.addf %142, %143 : vector<8x32xf32>
    %145 = math.tanh %144 : vector<8x32xf32>
    %146 = arith.mulf %139, %145 : vector<8x32xf32>
    %c6_i32 = arith.constant 6 : i32
    %c8_i32_44 = arith.constant 8 : i32
    %147 = arith.muli %c6_i32, %c8_i32_44 : i32
    %148 = tpu.assume_multiple %147, 8 : i32
    %149 = arith.index_cast %148 : i32 to index
    %c0_45 = arith.constant 0 : index
    %150 = vector.load %arg7[%149, %c0_45] : memref<64x128xf32, #tpu.memory_space<vmem>>, vector<8x128xf32>
    %151 = arith.truncf %146 : vector<8x32xf32> to vector<8x32xbf16>
    %c0_46 = arith.constant 0 : index
    %c0_47 = arith.constant 0 : index
    %152 = vector.load %arg2[%c0_46, %c0_47] : memref<32x128xbf16, #tpu.memory_space<vmem>>, vector<32x128xbf16>
    %cst_48 = arith.constant dense<0.000000e+00> : vector<8x128xf32>
    %153 = tpu.matmul %151, %152, %cst_48 {dimension_numbers = #tpu.dot_dimension_numbers<[1], [0], [0], [1], [0, 0, 1, 1], [], []>} : vector<8x32xbf16>, vector<32x128xbf16>, vector<8x128xf32> -> vector<8x128xf32>
    %154 = arith.addf %150, %153 : vector<8x128xf32>
    %155 = arith.negf %154 : vector<8x128xf32>
    %156 = math.exp %155 : vector<8x128xf32>
    %cst_49 = arith.constant 1.000000e+00 : f32
    %157 = vector.broadcast %cst_49 : f32 to vector<8x128xf32>
    %158 = arith.addf %157, %156 : vector<8x128xf32>
    %159 = arith.divf %157, %158 : vector<8x128xf32>
    %160 = vector.extract_strided_slice %159 {offsets = [0, 0], sizes = [8, 32], strides = [1, 1]} : vector<8x128xf32> to vector<8x32xf32>
    %161 = vector.extract_strided_slice %159 {offsets = [0, 32], sizes = [8, 32], strides = [1, 1]} : vector<8x128xf32> to vector<8x32xf32>
    %162 = vector.extract_strided_slice %159 {offsets = [0, 96], sizes = [8, 32], strides = [1, 1]} : vector<8x128xf32> to vector<8x32xf32>
    %163 = vector.extract_strided_slice %154 {offsets = [0, 64], sizes = [8, 32], strides = [1, 1]} : vector<8x128xf32> to vector<8x32xf32>
    %164 = math.tanh %163 : vector<8x32xf32>
    %165 = arith.mulf %161, %144 : vector<8x32xf32>
    %166 = arith.mulf %160, %164 : vector<8x32xf32>
    %167 = arith.addf %165, %166 : vector<8x32xf32>
    %168 = math.tanh %167 : vector<8x32xf32>
    %169 = arith.mulf %162, %168 : vector<8x32xf32>
    %c7_i32 = arith.constant 7 : i32
    %c8_i32_50 = arith.constant 8 : i32
    %170 = arith.muli %c7_i32, %c8_i32_50 : i32
    %171 = tpu.assume_multiple %170, 8 : i32
    %172 = arith.index_cast %171 : i32 to index
    %c0_51 = arith.constant 0 : index
    %173 = vector.load %arg7[%172, %c0_51] : memref<64x128xf32, #tpu.memory_space<vmem>>, vector<8x128xf32>
    %174 = arith.truncf %169 : vector<8x32xf32> to vector<8x32xbf16>
    %c0_52 = arith.constant 0 : index
    %c0_53 = arith.constant 0 : index
    %175 = vector.load %arg2[%c0_52, %c0_53] : memref<32x128xbf16, #tpu.memory_space<vmem>>, vector<32x128xbf16>
    %cst_54 = arith.constant dense<0.000000e+00> : vector<8x128xf32>
    %176 = tpu.matmul %174, %175, %cst_54 {dimension_numbers = #tpu.dot_dimension_numbers<[1], [0], [0], [1], [0, 0, 1, 1], [], []>} : vector<8x32xbf16>, vector<32x128xbf16>, vector<8x128xf32> -> vector<8x128xf32>
    %177 = arith.addf %173, %176 : vector<8x128xf32>
    %178 = arith.negf %177 : vector<8x128xf32>
    %179 = math.exp %178 : vector<8x128xf32>
    %cst_55 = arith.constant 1.000000e+00 : f32
    %180 = vector.broadcast %cst_55 : f32 to vector<8x128xf32>
    %181 = arith.addf %180, %179 : vector<8x128xf32>
    %182 = arith.divf %180, %181 : vector<8x128xf32>
    %183 = vector.extract_strided_slice %182 {offsets = [0, 0], sizes = [8, 32], strides = [1, 1]} : vector<8x128xf32> to vector<8x32xf32>
    %184 = vector.extract_strided_slice %182 {offsets = [0, 32], sizes = [8, 32], strides = [1, 1]} : vector<8x128xf32> to vector<8x32xf32>
    %185 = vector.extract_strided_slice %182 {offsets = [0, 96], sizes = [8, 32], strides = [1, 1]} : vector<8x128xf32> to vector<8x32xf32>
    %186 = vector.extract_strided_slice %177 {offsets = [0, 64], sizes = [8, 32], strides = [1, 1]} : vector<8x128xf32> to vector<8x32xf32>
    %187 = math.tanh %186 : vector<8x32xf32>
    %188 = arith.mulf %184, %167 : vector<8x32xf32>
    %189 = arith.mulf %183, %187 : vector<8x32xf32>
    %190 = arith.addf %188, %189 : vector<8x32xf32>
    %191 = math.tanh %190 : vector<8x32xf32>
    %192 = arith.mulf %185, %191 : vector<8x32xf32>
    %c8_i32_56 = arith.constant 8 : i32
    %c0_57 = arith.constant 0 : index
    %c0_58 = arith.constant 0 : index
    %193 = vector.load %arg4[%c0_57, %c0_58] : memref<32x4xf32, #tpu.memory_space<vmem>>, vector<32x4xf32>
    %cst_59 = arith.constant dense<0.000000e+00> : vector<8x4xf32>
    %194 = tpu.matmul %192, %193, %cst_59 {dimension_numbers = #tpu.dot_dimension_numbers<[1], [0], [0], [1], [0, 0, 1, 1], [], []>} : vector<8x32xf32>, vector<32x4xf32>, vector<8x4xf32> -> vector<8x4xf32>
    %c0_60 = arith.constant 0 : index
    %c0_61 = arith.constant 0 : index
    %195 = vector.load %arg5[%c0_60, %c0_61] : memref<1x4xf32, #tpu.memory_space<vmem>>, vector<1x4xf32>
    %196 = vector.broadcast %195 : vector<1x4xf32> to vector<8x4xf32>
    %197 = arith.addf %194, %196 : vector<8x4xf32>
    %198 = arith.negf %197 : vector<8x4xf32>
    %199 = math.exp %198 : vector<8x4xf32>
    %cst_62 = arith.constant 1.000000e+00 : f32
    %200 = vector.broadcast %cst_62 : f32 to vector<8x4xf32>
    %201 = arith.addf %200, %199 : vector<8x4xf32>
    %202 = arith.divf %200, %201 : vector<8x4xf32>
    %c0_63 = arith.constant 0 : index
    %c0_64 = arith.constant 0 : index
    %203 = vector.load %arg6[%c0_63, %c0_64] : memref<8x4xf32, #tpu.memory_space<vmem>>, vector<8x4xf32>
    tpu.vector_store %arg6[%c0_63, %c0_64], %202 {strides = array<i32>} : memref<8x4xf32, #tpu.memory_space<vmem>>, vector<8x4xf32>,
    return
  }
}

</mosaic_0001>

<bundles_post_ra>
// kernel: simple_rnn_classification.1
= control target key start
LH: loop header
LB: loop body
LE: loop exit
PB: predicated region body
PF: predicated region fallthrough
CT: control target
= control target key end

     0   :  { %vm64_vm0 = vcmask 130048   ;;  %v793_v4 = vmov 0   ;;  %s794_s29 = smov 64   ;;  %vm131_vm5 = vcmask 261120   ;;  %s947_s1 = inlined_call_operand.vmem [shape: bf16[16,128], index: 1, kind: input, shape index: {}]   ;;  %s948_s2 = inlined_call_operand.vmem [shape: bf16[32,128], index: 2, kind: input, shape index: {}]   ;;  %s949_s0 = inlined_call_operand.vmem [shape: bf16[64,16], index: 0, kind: input, shape index: {}]   ;;  %s950_s3 = inlined_call_operand.vmem [shape: f32[1,128], index: 3, kind: input, shape index: {}]   ;;  %s951_s4 = inlined_call_operand.vmem [shape: f32[32,4], index: 4, kind: input, shape index: {}]   ;;  %s952_s5 = inlined_call_operand.vmem [shape: f32[1,4], index: 5, kind: input, shape index: {}]   ;;  %s953_s6 = inlined_call_operand.vmem [shape: f32[8,4], index: 6, kind: output, shape index: {}]  }
   0x1   :  { %v717_v0 = vld [vmem:[%s947_s1] sm:$0xff]  ;;  %v837_v1 = vld [vmem:[%s948_s2 + $0x8] sm:$0xff] }
   0x2   :  { %v713_v2 = vld [vmem:[%s949_s0] sm:$0xff]  ;;  %84 = vmatpush.bf16.msra.mxu0 %v717_v0  ;;  %141 = vmatpush.bf16.msra.mxu1 %v837_v1  ;;  %v714_v60 = vld [vmem:[%s949_s0 + $0x8] sm:$0xff] }
   0x3   :  { %v846_v3 = vld [vmem:[%s948_s2] sm:$0xff]  ;;  %201 = vmatpush.bf16.msra.mxu2 %v837_v1  ;;  %261 = vmatpush.bf16.msra.mxu3 %v837_v1 }
   0x4   :  { %v865_v5 = vld [vmem:[%s950_s3] ss:$0 sm:$0xff]  ;;  %s795_s3 = smov 32  }
   0x5   :  { %684 = vmatmul.msk.bf16.vlgmr.msra.gmra.mxu0 %vm64_vm0, %v713_v2 }
   0x6   :  { %142 = vmatpush.bf16.msra.mxu1 %v846_v3 }
   0x7   :  { %202 = vmatpush.bf16.msra.mxu2 %v846_v3  ;;  %262 = vmatpush.bf16.msra.mxu3 %v846_v3 }
   0x9   :  { %143 = vmatmul.bf16.vlgmr.msra.gmra.mxu1 %v793_v4 }
   0xa   :  { %321 = vmatpush.bf16.msrb.mxu1 %v837_v1 }
   0xb   :  { %381 = vmatpush.bf16.msrb.mxu2 %v837_v1  ;;  %441 = vmatpush.bf16.msrb.mxu3 %v837_v1 }
   0xe   :  { %322 = vmatpush.bf16.msrb.mxu1 %v846_v3 }
   0xf   :  { %382 = vmatpush.bf16.msrb.mxu2 %v846_v3  ;;  %442 = vmatpush.bf16.msrb.mxu3 %v846_v3 }
  0x12   :  { %501 = vmatpush.bf16.msra.mxu1 %v837_v1 }
  0x15   :  { %685 = vmatmul.msk.bf16.gmra.mxu0 %vm64_vm0, %v714_v60 }
  0x16   :  { %502 = vmatpush.bf16.msra.mxu1 %v846_v3 }
  0x82   :  { %v86_v6 = vpop.f32.mrf.mxu0 }
  0x83   :  { %v87_v7 = vadd.f32 %v865_v5, %v86_v6 }
  0x86   :  { %v144_v8 = vpop.f32.mrf.mxu1 }
  0x87   :  { %v148_v9 = vadd.f32 %v144_v8, %v87_v7 }
  0x89   :  { %725 = vtanh.f32 %v148_v9  ;;  %v696_v12 = vmul.f32 -1.442695, %v148_v9 }
  0x8a   :  { %v88_v35 = vpop.f32.mrf.mxu0 }
  0x8b   :  { %727 = vpow2.f32 %v696_v12  ;;  %v89_v36 = vadd.f32 %v865_v5, %v88_v35 }
  0x8e   :  { %v146_v10 = vpop.f32.mrf.mxu1 }
  0x8f   :  { %v726_v11 = vpop.eup %725 }
  0x90   :  { %171 = vrot.lane.b32.xlu0 %v726_v11, %s794_s29 }
  0x91   :  { %v728_v13 = vpop.eup %727 }
  0x92   :  { %v152_v14 = vadd.f32 1.0, %v728_v13 }
  0x94   :  { %729 = vrcp.f32 %v152_v14  ;;  %v164_v20 = vand.u32 2147483648, %v152_v14  ;;  %vm158_vm2 = vweird.f32 %v152_v14  ;;  %v162_v21 = vand.u32 2147483647, %v152_v14 }
  0x96   :  { %v165_v23 = vor.u32 1.1754944e-38, %v164_v20  ;;  %vm163_vm4 = vcmp.eq.f32.partialorder %v162_v21, 8.507059e+37 }
  0x9a   :  { %v730_v15 = vpop.eup %729 }
  0x9b   :  { %v154_v16 = vmul.f32 %v730_v15, %v152_v14  ;;  %vm159_vm1 = vweird.f32 %v730_v15 }
  0x9c   :  { %vm160_vm3 = vmor %vm158_vm2, %vm159_vm1 }
  0x9d   :  { %v155_v17 = vsub.f32 1.0, %v154_v16 }
  0x9f   :  { %v156_v18 = vmul.f32 %v730_v15, %v155_v17 }
  0xa1   :  { %v157_v19 = vadd.f32 %v730_v15, %v156_v18 }
  0xa3   :  { %v161_v22 = vsel %vm160_vm3, %v730_v15, %v157_v19 }
  0xa4   :  { %v166_v25 = vsel %vm163_vm4, %v165_v23, %v161_v22 }
  0xa5   :  { %v169_v27 = vmul.f32 0.0, %v166_v25 }
 0x102   :  { %v172_v24 = vpop.permute.xlu0 %171 }
 0x103   :  { %v174_v26 = vmul.f32 %v172_v24, %v166_v25 }
 0x105   :  { %176 = vrot.lane.b32.xlu0 %v174_v26, %s795_s3 }
 0x177   :  { %v177_v28 = vpop.permute.xlu0 %176 }
 0x178   :  { %v179_v29 = vadd.f32 %v177_v28, %v169_v27 }
 0x17a   :  { %731 = vtanh.f32 %v179_v29 }
 0x180   :  { %v732_v30 = vpop.eup %731 }
 0x181   :  { %182 = vrot.lane.b32.xlu1 %v732_v30, %s794_s29 }
 0x1f3   :  { %v183_v31 = vpop.permute.xlu1 %182 }
 0x1f4   :  { %v185_v32 = vmul.f32 %v183_v31, %v166_v25 }
 0x1f6   :  { %v188_v33 = vpack.c.bf16 %v185_v32, %v185_v32 }
 0x1f8   :  { %190 = vrot.lane.b32.xlu1 %v188_v33, %s795_s3 }
 0x26a   :  { %v191_v34 = vpop.permute.xlu1 %190 }
 0x26b   :  { %697 = vmatmul.msk.bf16.vlgmr.msra.gmra.mxu2 %vm131_vm5, %v191_v34 }
 0x26c   :  { %561 = vmatpush.bf16.msra.mxu2 %v837_v1  ;;  %v91_v1 = vpop.f32.mrf.mxu0 }
 0x26d   :  { %v92_v2 = vadd.f32 %v865_v5, %v91_v1 }
 0x270   :  { %562 = vmatpush.bf16.msra.mxu2 %v846_v3 }
 0x274   :  { %v93_v31 = vpop.f32.mrf.mxu0 }
 0x275   :  { %v94_v32 = vadd.f32 %v865_v5, %v93_v31 }
 0x2ee   :  { %v204_v37 = vpop.f32.mrf.mxu2 }
 0x2ef   :  { %v208_v38 = vadd.f32 %v204_v37, %v89_v36 }
 0x2f1   :  { %733 = vtanh.f32 %v208_v38  ;;  %v698_v41 = vmul.f32 -1.442695, %v208_v38 }
 0x2f3   :  { %735 = vpow2.f32 %v698_v41 }
 0x2f6   :  { %v206_v39 = vpop.f32.mrf.mxu2 }
 0x2f7   :  { %v734_v40 = vpop.eup %733 }
 0x2f8   :  { %231 = vrot.lane.b32.xlu2 %v734_v40, %s794_s29 }
 0x2f9   :  { %v736_v42 = vpop.eup %735 }
 0x2fa   :  { %v212_v43 = vadd.f32 1.0, %v736_v42 }
 0x2fc   :  { %737 = vrcp.f32 %v212_v43  ;;  %v224_v49 = vand.u32 2147483648, %v212_v43  ;;  %vm218_vm7 = vweird.f32 %v212_v43  ;;  %v222_v50 = vand.u32 2147483647, %v212_v43 }
 0x2fe   :  { %v225_v52 = vor.u32 1.1754944e-38, %v224_v49  ;;  %vm223_vm9 = vcmp.eq.f32.partialorder %v222_v50, 8.507059e+37 }
 0x302   :  { %v738_v44 = vpop.eup %737 }
 0x303   :  { %v214_v45 = vmul.f32 %v738_v44, %v212_v43  ;;  %vm219_vm6 = vweird.f32 %v738_v44 }
 0x304   :  { %vm220_vm8 = vmor %vm218_vm7, %vm219_vm6 }
 0x305   :  { %v215_v46 = vsub.f32 1.0, %v214_v45 }
 0x307   :  { %v216_v47 = vmul.f32 %v738_v44, %v215_v46 }
 0x309   :  { %v217_v48 = vadd.f32 %v738_v44, %v216_v47 }
 0x30b   :  { %v221_v51 = vsel %vm220_vm8, %v738_v44, %v217_v48 }
 0x30c   :  { %v226_v54 = vsel %vm223_vm9, %v225_v52, %v221_v51 }
 0x30d   :  { %v229_v56 = vmul.f32 %v226_v54, %v179_v29 }
 0x352   :  { %v232_v53 = vpop.permute.xlu2 %231 }
 0x353   :  { %v234_v55 = vmul.f32 %v232_v53, %v226_v54 }
 0x355   :  { %236 = vrot.lane.b32.xlu2 %v234_v55, %s795_s3 }
 0x3af   :  { %v237_v57 = vpop.permute.xlu2 %236 }
 0x3b0   :  { %v239_v58 = vadd.f32 %v237_v57, %v229_v56  ;;  %v715_v56 = vld [vmem:[%s949_s0 + $0x10] sm:$0xff] }
 0x3b1   :  { %686 = vmatmul.msk.bf16.gmra.mxu0 %vm64_vm0, %v715_v56 }
 0x3b2   :  { %739 = vtanh.f32 %v239_v58 }
 0x3b8   :  { %v740_v59 = vpop.eup %739 }
 0x3b9   :  { %242 = vrot.lane.b32.xlu0 %v740_v59, %s794_s29 }
 0x42b   :  { %v243_v61 = vpop.permute.xlu0 %242 }
 0x42c   :  { %v245_v62 = vmul.f32 %v243_v61, %v226_v54 }
 0x42e   :  { %v248_v63 = vpack.c.bf16 %v245_v62, %v245_v62  ;;  %v96_v61 = vpop.f32.mrf.mxu0 }
 0x42f   :  { %v97_v62 = vadd.f32 %v865_v5, %v96_v61 }
 0x430   :  { %250 = vrot.lane.b32.xlu1 %v248_v63, %s795_s3 }
 0x4a2   :  { %v251_v0 = vpop.permute.xlu1 %250 }
 0x4a3   :  { %699 = vmatmul.msk.bf16.vlgmr.msra.gmra.mxu3 %vm131_vm5, %v251_v0 }
 0x526   :  { %v264_v3 = vpop.f32.mrf.mxu3 }
 0x527   :  { %v268_v4 = vadd.f32 %v264_v3, %v92_v2 }
 0x529   :  { %741 = vtanh.f32 %v268_v4  ;;  %v700_v8 = vmul.f32 -1.442695, %v268_v4 }
 0x52b   :  { %743 = vpow2.f32 %v700_v8 }
 0x52e   :  { %v266_v6 = vpop.f32.mrf.mxu3 }
 0x52f   :  { %v742_v7 = vpop.eup %741 }
 0x530   :  { %291 = vrot.lane.b32.xlu2 %v742_v7, %s794_s29 }
 0x531   :  { %v744_v9 = vpop.eup %743 }
 0x532   :  { %v272_v10 = vadd.f32 1.0, %v744_v9 }
 0x534   :  { %745 = vrcp.f32 %v272_v10  ;;  %v284_v16 = vand.u32 2147483648, %v272_v10  ;;  %vm278_vm11 = vweird.f32 %v272_v10  ;;  %v282_v17 = vand.u32 2147483647, %v272_v10 }
 0x536   :  { %v285_v19 = vor.u32 1.1754944e-38, %v284_v16  ;;  %vm283_vm13 = vcmp.eq.f32.partialorder %v282_v17, 8.507059e+37 }
 0x53a   :  { %v746_v11 = vpop.eup %745 }
 0x53b   :  { %v274_v12 = vmul.f32 %v746_v11, %v272_v10  ;;  %vm279_vm10 = vweird.f32 %v746_v11 }
 0x53c   :  { %vm280_vm12 = vmor %vm278_vm11, %vm279_vm10 }
 0x53d   :  { %v275_v13 = vsub.f32 1.0, %v274_v12 }
 0x53f   :  { %v276_v14 = vmul.f32 %v746_v11, %v275_v13 }
 0x541   :  { %v277_v15 = vadd.f32 %v746_v11, %v276_v14 }
 0x543   :  { %v281_v18 = vsel %vm280_vm12, %v746_v11, %v277_v15 }
 0x544   :  { %v286_v21 = vsel %vm283_vm13, %v285_v19, %v281_v18 }
 0x545   :  { %v289_v23 = vmul.f32 %v286_v21, %v239_v58 }
 0x58a   :  { %v292_v20 = vpop.permute.xlu2 %291 }
 0x58b   :  { %v294_v22 = vmul.f32 %v292_v20, %v286_v21 }
 0x58d   :  { %296 = vrot.lane.b32.xlu0 %v294_v22, %s795_s3 }
 0x5ff   :  { %v297_v24 = vpop.permute.xlu0 %296 }
 0x600   :  { %v299_v25 = vadd.f32 %v297_v24, %v289_v23 }
 0x602   :  { %747 = vtanh.f32 %v299_v25 }
 0x608   :  { %v748_v26 = vpop.eup %747 }
 0x609   :  { %302 = vrot.lane.b32.xlu1 %v748_v26, %s794_s29 }
 0x67b   :  { %v303_v27 = vpop.permute.xlu1 %302 }
 0x67c   :  { %v305_v28 = vmul.f32 %v303_v27, %v286_v21  ;;  %v98_v27 = vpop.f32.mrf.mxu0 }
 0x67e   :  { %v308_v29 = vpack.c.bf16 %v305_v28, %v305_v28  ;;  %v99_v28 = vadd.f32 %v865_v5, %v98_v27 }
 0x680   :  { %310 = vrot.lane.b32.xlu2 %v308_v29, %s795_s3 }
 0x6da   :  { %v311_v30 = vpop.permute.xlu2 %310 }
 0x6db   :  { %701 = vmatmul.msk.bf16.vlgmr.msrb.gmra.mxu1 %vm131_vm5, %v311_v30 }
 0x758   :  { %v324_v33 = vpop.f32.mrf.mxu1 }
 0x759   :  { %v328_v34 = vadd.f32 %v324_v33, %v94_v32 }
 0x75b   :  { %749 = vtanh.f32 %v328_v34  ;;  %v702_v37 = vmul.f32 -1.442695, %v328_v34 }
 0x75d   :  { %751 = vpow2.f32 %v702_v37 }
 0x760   :  { %v326_v35 = vpop.f32.mrf.mxu1 }
 0x761   :  { %v750_v36 = vpop.eup %749 }
 0x762   :  { %351 = vrot.lane.b32.xlu0 %v750_v36, %s794_s29 }
 0x763   :  { %v752_v38 = vpop.eup %751 }
 0x764   :  { %v332_v39 = vadd.f32 1.0, %v752_v38 }
 0x766   :  { %753 = vrcp.f32 %v332_v39  ;;  %v344_v45 = vand.u32 2147483648, %v332_v39  ;;  %vm338_vm15 = vweird.f32 %v332_v39  ;;  %v342_v46 = vand.u32 2147483647, %v332_v39 }
 0x768   :  { %v345_v48 = vor.u32 1.1754944e-38, %v344_v45  ;;  %vm343_vm2 = vcmp.eq.f32.partialorder %v342_v46, 8.507059e+37 }
 0x76c   :  { %v754_v40 = vpop.eup %753 }
 0x76d   :  { %v334_v41 = vmul.f32 %v754_v40, %v332_v39  ;;  %vm339_vm14 = vweird.f32 %v754_v40 }
 0x76e   :  { %vm340_vm1 = vmor %vm338_vm15, %vm339_vm14 }
 0x76f   :  { %v335_v42 = vsub.f32 1.0, %v334_v41 }
 0x771   :  { %v336_v43 = vmul.f32 %v754_v40, %v335_v42 }
 0x773   :  { %v337_v44 = vadd.f32 %v754_v40, %v336_v43 }
 0x775   :  { %v341_v47 = vsel %vm340_vm1, %v754_v40, %v337_v44 }
 0x776   :  { %v346_v50 = vsel %vm343_vm2, %v345_v48, %v341_v47 }
 0x777   :  { %v349_v52 = vmul.f32 %v346_v50, %v299_v25 }
 0x7d4   :  { %v352_v49 = vpop.permute.xlu0 %351 }
 0x7d5   :  { %v354_v51 = vmul.f32 %v352_v49, %v346_v50 }
 0x7d7   :  { %356 = vrot.lane.b32.xlu1 %v354_v51, %s795_s3 }
 0x849   :  { %v357_v53 = vpop.permute.xlu1 %356 }
 0x84a   :  { %v359_v54 = vadd.f32 %v357_v53, %v349_v52  ;;  %v716_v52 = vld [vmem:[%s949_s0 + $0x18] sm:$0xff] }
 0x84b   :  { %687 = vmatmul.msk.bf16.gmra.mxu0 %vm64_vm0, %v716_v52 }
 0x84c   :  { %755 = vtanh.f32 %v359_v54 }
 0x852   :  { %v756_v55 = vpop.eup %755 }
 0x853   :  { %362 = vrot.lane.b32.xlu2 %v756_v55, %s794_s29 }
 0x8ad   :  { %v363_v57 = vpop.permute.xlu2 %362 }
 0x8ae   :  { %v365_v58 = vmul.f32 %v363_v57, %v346_v50 }
 0x8b0   :  { %v368_v59 = vpack.c.bf16 %v365_v58, %v365_v58 }
 0x8b2   :  { %370 = vrot.lane.b32.xlu0 %v368_v59, %s795_s3 }
 0x8c8   :  { %v101_v57 = vpop.f32.mrf.mxu0 }
 0x8c9   :  { %v102_v58 = vadd.f32 %v865_v5, %v101_v57 }
 0x924   :  { %v371_v60 = vpop.permute.xlu0 %370 }
 0x925   :  { %703 = vmatmul.msk.bf16.vlgmr.msrb.gmra.mxu2 %vm131_vm5, %v371_v60 }
 0x9a8   :  { %v384_v63 = vpop.f32.mrf.mxu2 }
 0x9a9   :  { %v388_v0 = vadd.f32 %v384_v63, %v97_v62 }
 0x9ab   :  { %757 = vtanh.f32 %v388_v0  ;;  %v704_v3 = vmul.f32 -1.442695, %v388_v0 }
 0x9ad   :  { %759 = vpow2.f32 %v704_v3 }
 0x9b0   :  { %v386_v1 = vpop.f32.mrf.mxu2 }
 0x9b1   :  { %v758_v2 = vpop.eup %757 }
 0x9b2   :  { %411 = vrot.lane.b32.xlu1 %v758_v2, %s794_s29 }
 0x9b3   :  { %v760_v4 = vpop.eup %759 }
 0x9b4   :  { %v392_v6 = vadd.f32 1.0, %v760_v4 }
 0x9b6   :  { %761 = vrcp.f32 %v392_v6  ;;  %v404_v12 = vand.u32 2147483648, %v392_v6  ;;  %vm398_vm4 = vweird.f32 %v392_v6  ;;  %v402_v13 = vand.u32 2147483647, %v392_v6 }
 0x9b8   :  { %v405_v15 = vor.u32 1.1754944e-38, %v404_v12  ;;  %vm403_vm7 = vcmp.eq.f32.partialorder %v402_v13, 8.507059e+37 }
 0x9bc   :  { %v762_v7 = vpop.eup %761 }
 0x9bd   :  { %v394_v8 = vmul.f32 %v762_v7, %v392_v6  ;;  %vm399_vm3 = vweird.f32 %v762_v7 }
 0x9be   :  { %vm400_vm6 = vmor %vm398_vm4, %vm399_vm3 }
 0x9bf   :  { %v395_v9 = vsub.f32 1.0, %v394_v8 }
 0x9c1   :  { %v396_v10 = vmul.f32 %v762_v7, %v395_v9 }
 0x9c3   :  { %v397_v11 = vadd.f32 %v762_v7, %v396_v10 }
 0x9c5   :  { %v401_v14 = vsel %vm400_vm6, %v762_v7, %v397_v11 }
 0x9c6   :  { %v406_v17 = vsel %vm403_vm7, %v405_v15, %v401_v14  ;;  %vm658_vm7 = vcmask 31744  }
 0x9c7   :  { %v409_v19 = vmul.f32 %v406_v17, %v359_v54 }
 0xa24   :  { %v412_v16 = vpop.permute.xlu1 %411 }
 0xa25   :  { %v414_v18 = vmul.f32 %v412_v16, %v406_v17 }
 0xa27   :  { %416 = vrot.lane.b32.xlu2 %v414_v18, %s795_s3 }
 0xa81   :  { %v417_v20 = vpop.permute.xlu2 %416 }
 0xa82   :  { %v419_v21 = vadd.f32 %v417_v20, %v409_v19 }
 0xa84   :  { %763 = vtanh.f32 %v419_v21 }
 0xa8a   :  { %v764_v22 = vpop.eup %763 }
 0xa8b   :  { %422 = vrot.lane.b32.xlu0 %v764_v22, %s794_s29 }
 0xafd   :  { %v423_v23 = vpop.permute.xlu0 %422 }
 0xafe   :  { %v425_v24 = vmul.f32 %v423_v23, %v406_v17  ;;  %v103_v23 = vpop.f32.mrf.mxu0 }
 0xb00   :  { %v428_v25 = vpack.c.bf16 %v425_v24, %v425_v24  ;;  %v104_v24 = vadd.f32 %v865_v5, %v103_v23 }
 0xb02   :  { %430 = vrot.lane.b32.xlu1 %v428_v25, %s795_s3 }
 0xb74   :  { %v431_v26 = vpop.permute.xlu1 %430 }
 0xb75   :  { %705 = vmatmul.msk.bf16.vlgmr.msrb.gmra.mxu3 %vm131_vm5, %v431_v26 }
 0xbf8   :  { %v444_v29 = vpop.f32.mrf.mxu3 }
 0xbf9   :  { %v448_v30 = vadd.f32 %v444_v29, %v99_v28 }
 0xbfb   :  { %765 = vtanh.f32 %v448_v30  ;;  %v706_v33 = vmul.f32 -1.442695, %v448_v30 }
 0xbfd   :  { %767 = vpow2.f32 %v706_v33 }
 0xc00   :  { %v446_v31 = vpop.f32.mrf.mxu3 }
 0xc01   :  { %v766_v32 = vpop.eup %765 }
 0xc02   :  { %471 = vrot.lane.b32.xlu2 %v766_v32, %s794_s29 }
 0xc03   :  { %v768_v34 = vpop.eup %767 }
 0xc04   :  { %v452_v35 = vadd.f32 1.0, %v768_v34 }
 0xc06   :  { %769 = vrcp.f32 %v452_v35  ;;  %v464_v41 = vand.u32 2147483648, %v452_v35  ;;  %vm458_vm9 = vweird.f32 %v452_v35  ;;  %v462_v42 = vand.u32 2147483647, %v452_v35 }
 0xc08   :  { %v465_v44 = vor.u32 1.1754944e-38, %v464_v41  ;;  %vm463_vm11 = vcmp.eq.f32.partialorder %v462_v42, 8.507059e+37 }
 0xc0c   :  { %v770_v36 = vpop.eup %769 }
 0xc0d   :  { %v454_v37 = vmul.f32 %v770_v36, %v452_v35  ;;  %vm459_vm8 = vweird.f32 %v770_v36 }
 0xc0e   :  { %vm460_vm10 = vmor %vm458_vm9, %vm459_vm8 }
 0xc0f   :  { %v455_v38 = vsub.f32 1.0, %v454_v37 }
 0xc11   :  { %v456_v39 = vmul.f32 %v770_v36, %v455_v38 }
 0xc13   :  { %v457_v40 = vadd.f32 %v770_v36, %v456_v39 }
 0xc15   :  { %v461_v43 = vsel %vm460_vm10, %v770_v36, %v457_v40 }
 0xc16   :  { %v466_v46 = vsel %vm463_vm11, %v465_v44, %v461_v43 }
 0xc17   :  { %v469_v48 = vmul.f32 %v466_v46, %v419_v21 }
 0xc5c   :  { %v472_v45 = vpop.permute.xlu2 %471 }
 0xc5d   :  { %v474_v47 = vmul.f32 %v472_v45, %v466_v46 }
 0xc5f   :  { %476 = vrot.lane.b32.xlu0 %v474_v47, %s795_s3  ;;  %v609_v47 = vld [vmem:[%s951_s4 + $0x18] sm:$0xff] }
 0xc60   :  { %631 = vmatpush.msra.mxu3 %v609_v47 }
 0xcd1   :  { %v477_v49 = vpop.permute.xlu0 %476 }
 0xcd2   :  { %v479_v50 = vadd.f32 %v477_v49, %v469_v48  ;;  %v608_v48 = vld [vmem:[%s951_s4 + $0x10] sm:$0xff]  ;;  %v607_v49 = vld [vmem:[%s951_s4 + $0x8] sm:$0xff] }
 0xcd3   :  { %632 = vmatpush.msra.mxu3 %v608_v48 }
 0xcd4   :  { %771 = vtanh.f32 %v479_v50 }
 0xcd5   :  { %633 = vmatpush.msra.mxu3 %v607_v49 }
 0xcda   :  { %v772_v51 = vpop.eup %771 }
 0xcdb   :  { %482 = vrot.lane.b32.xlu1 %v772_v51, %s794_s29 }
 0xd4d   :  { %v483_v53 = vpop.permute.xlu1 %482 }
 0xd4e   :  { %v485_v54 = vmul.f32 %v483_v53, %v466_v46 }
 0xd50   :  { %v488_v55 = vpack.c.bf16 %v485_v54, %v485_v54  ;;  %v724_v54 = vld [vmem:[%s952_s5] ss:$0 sm:$0xff] }
 0xd52   :  { %490 = vrot.lane.b32.xlu2 %v488_v55, %s795_s3 }
 0xdac   :  { %v491_v56 = vpop.permute.xlu2 %490 }
 0xdad   :  { %707 = vmatmul.msk.bf16.vlgmr.msra.gmra.mxu1 %vm131_vm5, %v491_v56 }
 0xe2a   :  { %v504_v59 = vpop.f32.mrf.mxu1 }
 0xe2b   :  { %v508_v60 = vadd.f32 %v504_v59, %v102_v58 }
 0xe2d   :  { %773 = vtanh.f32 %v508_v60  ;;  %v708_v63 = vmul.f32 -1.442695, %v508_v60 }
 0xe2f   :  { %775 = vpow2.f32 %v708_v63 }
 0xe32   :  { %v506_v61 = vpop.f32.mrf.mxu1 }
 0xe33   :  { %v774_v62 = vpop.eup %773 }
 0xe34   :  { %531 = vrot.lane.b32.xlu0 %v774_v62, %s794_s29 }
 0xe35   :  { %v776_v0 = vpop.eup %775 }
 0xe36   :  { %v512_v1 = vadd.f32 1.0, %v776_v0 }
 0xe38   :  { %777 = vrcp.f32 %v512_v1  ;;  %v524_v8 = vand.u32 2147483648, %v512_v1  ;;  %vm518_vm12 = vweird.f32 %v512_v1  ;;  %v522_v9 = vand.u32 2147483647, %v512_v1 }
 0xe3a   :  { %v525_v11 = vor.u32 1.1754944e-38, %v524_v8  ;;  %vm523_vm14 = vcmp.eq.f32.partialorder %v522_v9, 8.507059e+37 }
 0xe3e   :  { %v778_v2 = vpop.eup %777 }
 0xe3f   :  { %v514_v3 = vmul.f32 %v778_v2, %v512_v1  ;;  %vm519_vm0 = vweird.f32 %v778_v2 }
 0xe40   :  { %vm520_vm13 = vmor %vm518_vm12, %vm519_vm0 }
 0xe41   :  { %v515_v4 = vsub.f32 1.0, %v514_v3 }
 0xe43   :  { %v516_v6 = vmul.f32 %v778_v2, %v515_v4 }
 0xe45   :  { %v517_v7 = vadd.f32 %v778_v2, %v516_v6 }
 0xe47   :  { %v521_v10 = vsel %vm520_vm13, %v778_v2, %v517_v7 }
 0xe48   :  { %v526_v13 = vsel %vm523_vm14, %v525_v11, %v521_v10 }
 0xe49   :  { %v529_v15 = vmul.f32 %v526_v13, %v479_v50  ;;  %v606_v50 = vld [vmem:[%s951_s4] sm:$0xff] }
 0xe4a   :  { %634 = vmatpush.msra.mxu3 %v606_v50 }
 0xea6   :  { %v532_v12 = vpop.permute.xlu0 %531 }
 0xea7   :  { %v534_v14 = vmul.f32 %v532_v12, %v526_v13 }
 0xea9   :  { %536 = vrot.lane.b32.xlu1 %v534_v14, %s795_s3 }
 0xf1b   :  { %v537_v16 = vpop.permute.xlu1 %536 }
 0xf1c   :  { %v539_v17 = vadd.f32 %v537_v16, %v529_v15 }
 0xf1e   :  { %779 = vtanh.f32 %v539_v17 }
 0xf24   :  { %v780_v18 = vpop.eup %779 }
 0xf25   :  { %542 = vrot.lane.b32.xlu2 %v780_v18, %s794_s29 }
 0xf7f   :  { %v543_v19 = vpop.permute.xlu2 %542 }
 0xf80   :  { %v545_v20 = vmul.f32 %v543_v19, %v526_v13 }
 0xf82   :  { %v548_v21 = vpack.c.bf16 %v545_v20, %v545_v20 }
 0xf84   :  { %550 = vrot.lane.b32.xlu0 %v548_v21, %s795_s3 }
 0xff6   :  { %v551_v22 = vpop.permute.xlu0 %550 }
 0xff7   :  { %709 = vmatmul.msk.bf16.vlgmr.msra.gmra.mxu2 %vm131_vm5, %v551_v22 }
0x107a   :  { %v564_v25 = vpop.f32.mrf.mxu2 }
0x107b   :  { %v568_v26 = vadd.f32 %v564_v25, %v104_v24 }
0x107d   :  { %781 = vtanh.f32 %v568_v26  ;;  %v710_v29 = vmul.f32 -1.442695, %v568_v26 }
0x107f   :  { %783 = vpow2.f32 %v710_v29 }
0x1082   :  { %v566_v27 = vpop.f32.mrf.mxu2 }
0x1083   :  { %v782_v28 = vpop.eup %781 }
0x1084   :  { %591 = vrot.lane.b32.xlu1 %v782_v28, %s794_s29 }
0x1085   :  { %v784_v30 = vpop.eup %783 }
0x1086   :  { %v572_v31 = vadd.f32 1.0, %v784_v30 }
0x1088   :  { %785 = vrcp.f32 %v572_v31  ;;  %v584_v37 = vand.u32 2147483648, %v572_v31  ;;  %vm578_vm1 = vweird.f32 %v572_v31  ;;  %v582_v5 = vand.u32 2147483647, %v572_v31 }
0x108a   :  { %v585_v39 = vor.u32 1.1754944e-38, %v584_v37  ;;  %vm583_vm3 = vcmp.eq.f32.partialorder %v582_v5, 8.507059e+37 }
0x108e   :  { %v786_v32 = vpop.eup %785 }
0x108f   :  { %v574_v33 = vmul.f32 %v786_v32, %v572_v31  ;;  %vm579_vm15 = vweird.f32 %v786_v32 }
0x1090   :  { %vm580_vm2 = vmor %vm578_vm1, %vm579_vm15 }
0x1091   :  { %v575_v34 = vsub.f32 1.0, %v574_v33 }
0x1093   :  { %v576_v35 = vmul.f32 %v786_v32, %v575_v34 }
0x1095   :  { %v577_v36 = vadd.f32 %v786_v32, %v576_v35 }
0x1097   :  { %v581_v38 = vsel %vm580_vm2, %v786_v32, %v577_v36 }
0x1098   :  { %v586_v41 = vsel %vm583_vm3, %v585_v39, %v581_v38 }
0x1099   :  { %v589_v43 = vmul.f32 %v586_v41, %v539_v17 }
0x10f6   :  { %v592_v40 = vpop.permute.xlu1 %591 }
0x10f7   :  { %v594_v42 = vmul.f32 %v592_v40, %v586_v41 }
0x10f9   :  { %596 = vrot.lane.b32.xlu2 %v594_v42, %s795_s3 }
0x1153   :  { %v597_v44 = vpop.permute.xlu2 %596 }
0x1154   :  { %v599_v45 = vadd.f32 %v597_v44, %v589_v43 }
0x1156   :  { %787 = vtanh.f32 %v599_v45 }
0x115c   :  { %v788_v46 = vpop.eup %787 }
0x115d   :  { %602 = vrot.lane.b32.xlu0 %v788_v46, %s794_s29 }
0x11cf   :  { %v603_v51 = vpop.permute.xlu0 %602 }
0x11d0   :  { %v605_v52 = vmul.f32 %v603_v51, %v586_v41 }
0x11d2   :  { %615 = vrot.lane.b32.xlu1 %v605_v52, %s795_s3 }
0x1244   :  { %v616_v53 = vpop.permute.xlu1 %615 }
0x1245   :  { %711 = vmatmul.msk.f32.vlgmr.msra.gmra.mxu3 %vm131_vm5, %v616_v53 }
0x12c8   :  { %v636_v55 = vpop.f32.mrf.mxu3 }
0x12c9   :  { %v637_v56 = vadd.f32 %v724_v54, %v636_v55 }
0x12cb   :  { %v712_v57 = vmul.f32 -1.442695, %v637_v56 }
0x12cd   :  { %789 = vpow2.f32 %v712_v57 }
0x12d3   :  { %v790_v58 = vpop.eup %789 }
0x12d4   :  { %v642_v59 = vadd.f32 1.0, %v790_v58 }
0x12d6   :  { %791 = vrcp.f32 %v642_v59  ;;  %v654_v63 = vand.u32 2147483648, %v642_v59  ;;  %v652_v1 = vand.u32 2147483647, %v642_v59  ;;  %vm648_vm5 = vweird.f32 %v642_v59 }
0x12d8   :  { %v655_v3 = vor.u32 1.1754944e-38, %v654_v63  ;;  %vm653_vm8 = vcmp.eq.f32.partialorder %v652_v1, 8.507059e+37 }
0x12dc   :  { %v792_v60 = vpop.eup %791 }
0x12dd   :  { %v644_v61 = vmul.f32 %v792_v60, %v642_v59  ;;  %vm649_vm4 = vweird.f32 %v792_v60 }
0x12de   :  { %vm650_vm6 = vmor %vm648_vm5, %vm649_vm4 }
0x12df   :  { %v645_v62 = vsub.f32 1.0, %v644_v61 }
0x12e1   :  { %v646_v0 = vmul.f32 %v792_v60, %v645_v62 }
0x12e3   :  { %v647_v2 = vadd.f32 %v792_v60, %v646_v0 }
0x12e5   :  { %v651_v4 = vsel %vm650_vm6, %v792_v60, %v647_v2 }
0x12e6   :  { %v656_v6 = vsel %vm653_vm8, %v655_v3, %v651_v4 }
0x12e7   :  { %659 = vst.msk [vmem:[%s953_s6] sm:$0xff] %vm658_vm7, %v656_v6 }

</bundles_post_ra>
